<compile_context>
chip_gen: v6e
topology: v6e:2x2x1
jax: 0.10.0
libtpu: 0.0.40
codegen_flags: <defaults>
</compile_context>

<pallas_src>
import functools

import jax
import jax.numpy as jnp
from jax import lax
from jax.experimental import pallas as pl
from jax.experimental.pallas import tpu as pltpu

_NEG_INF = -1e30  # finite "-inf": keeps masked lanes away from inf - inf = NaN


def _round_up(x, m):
    return ((x + m - 1) // m) * m


def _pad2d(x, rows, cols):
    r, c = x.shape
    return jnp.pad(x, ((0, rows - r), (0, cols - c)))


def _l2_normalize(x, eps=1e-12):
    # matches torch.nn.functional.normalize(p=2, dim=-1, eps=1e-12);
    # rsqrt uses the EUP slot instead of sqrt + divide on the VALU.
    x = x.astype(jnp.float32)
    ss = jnp.sum(x * x, axis=-1, keepdims=True)
    return x * lax.rsqrt(jnp.maximum(ss, eps * eps))


def _lse_stream_kernel(q_ref, seed_ref, k_ref, bias_ref, out_ref,
                       l_scr, m_scr, *, shift, use_fixed_shift):
    """Streaming per-row logsumexp of  logits = keys @ q^T (+ bias), seeded.

    Grid = (q tiles ["parallel"], key tiles ["arbitrary"]).
      q_ref    : (TQ, Dp)  matmul dtype, pre-normalized * 1/T, resident over k
      seed_ref : (1, TQ)   f32 extra per-row logit (-1e30 => none), resident
      k_ref    : (TK, Dp)  matmul dtype, pre-normalized, pipelined over k
      bias_ref : (TK, 1)   f32 per-key bias (-shift valid / -1e30 padded key)
      out_ref  : (1, TQ)   f32 logsumexp, written once at the last key step
      l_scr    : (1, TQ)   running sum
      m_scr    : (1, TQ)   running max (only used when use_fixed_shift=False)
    """
    k = pl.program_id(1)

    # (TK, TQ) scores, f32 accumulation; contraction on the last (feature) dim
    # of both operands -> no XLU transpose in front of the MXU push.
    s = lax.dot_general(k_ref[...], q_ref[...],
                        dimension_numbers=(((1,), (1,)), ((), ())),
                        preferred_element_type=jnp.float32)
    s = s + bias_ref[...]   # broadcast (TK,1): key-pad mask (+ fixed shift)

    if use_fixed_shift:
        # |cosine|/T <= shift, so a constant shift stabilizes the logsumexp:
        # no running max (XLU reduce) and no exp-rescale of l per key step.
        @pl.when(k == 0)
        def _init():
            l_scr[...] = jnp.exp(seed_ref[...] - shift)

        l_scr[...] += jnp.sum(jnp.exp(s), axis=0, keepdims=True)

        @pl.when(k == pl.num_programs(1) - 1)
        def _finalize():
            out_ref[...] = shift + jnp.log(l_scr[...])
    else:
        # running-max (online softmax) fallback for very small temperatures.
        @pl.when(k == 0)
        def _init():
            m_scr[...] = seed_ref[...]
            l_scr[...] = jnp.ones_like(l_scr)

        m_prev = m_scr[...]
        m_new = jnp.maximum(m_prev, jnp.max(s, axis=0, keepdims=True))
        l_scr[...] = (jnp.exp(m_prev - m_new) * l_scr[...]
                      + jnp.sum(jnp.exp(s - m_new), axis=0, keepdims=True))
        m_scr[...] = m_new

        @pl.when(k == pl.num_programs(1) - 1)
        def _finalize():
            out_ref[...] = m_scr[...] + jnp.log(l_scr[...])


class MyInfoNCE:
    """JAX/Pallas port of the PyTorch MyInfoNCE module (forward pass only).

    matmul_dtype: dtype of the streamed q / key tiles (MXU operands).
        Accumulation and all softmax math stay f32.  jnp.bfloat16 is
        recommended on ALL TPU generations (v5e/v6e/v7x): it halves the HBM
        key-stream traffic and runs at the MXU's native bf16 rate.
    block_q / block_k: row-tile sizes for the query / key grid axes.  They are
        auto-shrunk to fit `vmem_budget_bytes` (keep the budget well under
        v7x's 64 MiB physical VMEM; v6e/v5e have 128 MiB).
    """

    def __init__(self, temperature=0.1, reduction='mean', negative_mode='unpaired',
                 metric='cosine', matmul_dtype=jnp.float32,
                 block_q=1024, block_k=512, vmem_budget_bytes=44 * 1024 * 1024):
        if reduction not in ('mean', 'sum', 'none'):
            raise ValueError("reduction must be one of ['none', 'sum', 'mean']")
        if metric != 'cosine':
            # TODO(synk): metric='euclidean' (torch.cdist) path not implemented.
            raise NotImplementedError("only metric='cosine' is implemented")
        self.temperature = float(temperature)
        self.reduction = reduction
        self.negative_mode = negative_mode
        self.metric = metric
        self.matmul_dtype = matmul_dtype
        self.block_q = int(block_q)
        self.block_k = int(block_k)
        self.vmem_budget_bytes = int(vmem_budget_bytes)

    # ------------------------------------------------------------------ API
    def __call__(self, query, positive_key, negative_keys=None):
        query = jnp.asarray(query)
        positive_key = jnp.asarray(positive_key)
        if query.ndim != 2:
            raise ValueError('<query> must have 2 dimensions.')
        if positive_key.ndim != 2:
            raise ValueError('<positive_key> must have 2 dimensions.')
        if query.shape[0] != positive_key.shape[0]:
            raise ValueError('<query> and <positive_key> must have the same number of samples.')
        if query.shape[-1] != positive_key.shape[-1]:
            raise ValueError('Vectors of <query> and <positive_key> should have the same '
                             'number of components.')

        if negative_keys is None:
            per_sample = self._per_sample_self(query, positive_key)
        else:
            negative_keys = jnp.asarray(negative_keys)
            if self.negative_mode != 'unpaired':
                # TODO(synk): negative_mode='paired' ((N, M, D) negatives) not implemented.
                raise NotImplementedError("only negative_mode='unpaired' is implemented")
            if negative_keys.ndim != 2:
                raise ValueError("<negative_keys> must have 2 dimensions if "
                                 "<negative_mode> == 'unpaired'.")
            if query.shape[-1] != negative_keys.shape[-1]:
                raise ValueError('Vectors of <query> and <negative_keys> should have the same '
                                 'number of components.')
            per_sample = self._per_sample_unpaired(query, negative_keys)

        if self.reduction == 'mean':
            return jnp.mean(per_sample)
        if self.reduction == 'sum':
            return jnp.sum(per_sample)
        return per_sample

    # ------------------------------------------------ unpaired negatives path
    def _per_sample_unpaired(self, query, negative_keys):
        n = query.shape[0]
        inv_t = 1.0 / self.temperature
        qn = _l2_normalize(query)                       # (N, D) f32
        nkn = _l2_normalize(negative_keys)              # (M, D) f32
        # positive logit = mean of the off-diagonal of (qn @ qn.T) / T, via the
        # rank-1 identity  (qn_i . S - qn_i . qn_i) / (N - 1),  S = sum_j qn_j.
        # O(N*D) in plain JAX -> no N x N similarity matmul, no separate S pass.
        s_vec = jnp.sum(qn, axis=0, keepdims=True)      # (1, D)
        diag = jnp.sum(qn * qn, axis=-1)                # (N,)
        # torch takes the mean over an empty masked row when N == 1 -> NaN; keep that.
        inv_nm1 = (1.0 / (n - 1)) if n > 1 else float('nan')
        pos = (jnp.sum(qn * s_vec, axis=-1) - diag) * (inv_t * inv_nm1)   # (N,)

        lse = self._stream_logsumexp(qn, nkn, seed=pos, inv_t=inv_t)
        # cross entropy with label 0: loss_i = logsumexp([pos_i, negs_i]) - pos_i
        return lse - pos

    # --------------------------------------------- in-batch negatives path
    def _per_sample_self(self, query, positive_key):
        n = query.shape[0]
        inv_t = 1.0 / self.temperature
        qn = _l2_normalize(query)
        pn = _l2_normalize(positive_key)
        target = jnp.sum(qn * pn, axis=-1) * inv_t      # label-i (diagonal) logit
        seed = jnp.full((n,), _NEG_INF, jnp.float32)    # diag is already in the stream
        lse = self._stream_logsumexp(qn, pn, seed=seed, inv_t=inv_t)
        return lse - target

    # ------------------------------------------------------- shared kernel
    def _stream_logsumexp(self, qn, keys, *, seed, inv_t):
        """Row-wise logsumexp of  concat([seed_i], qn_i . keys / T)  via Pallas."""
        n, d = qn.shape
        m = keys.shape[0]
        dp = _round_up(d, 128)
        esize = jnp.dtype(self.matmul_dtype).itemsize

        # ---- tile sizes (TQ is the lane dim of scores/out -> 128-align when tiled)
        tq = _round_up(min(self.block_q, n), 8)
        if tq < n:
            tq = max(128, _round_up(tq, 128))
        tk = _round_up(min(self.block_k, m), 8)

        def stream_bytes(tq_, tk_):
            # double-buffered q and key streams dominate; + stats/bias/seed/out.
            return 2 * (tq_ + tk_) * dp * esize + 4 * (4 * tq_ + 2 * tk_) * 4

        while stream_bytes(tq, tk) > self.vmem_budget_bytes and tk > 64:
            tk = max(64, tk // 2)
        while stream_bytes(tq, tk) > self.vmem_budget_bytes and tq > 128:
            tq = max(128, tq // 2)
        if tq < n:
            tq = max(128, (tq // 128) * 128)

        n_pad = _round_up(n, tq)
        m_pad = _round_up(m, tk)
        num_i = n_pad // tq
        num_k = m_pad // tk

        # fixed shift is valid while exp(-2/T) stays comfortably inside f32.
        use_fixed_shift = inv_t <= 40.0
        shift = float(inv_t) if use_fixed_shift else 0.0
        bias_valid = -shift if use_fixed_shift else 0.0

        # ---- pre-normalized / pre-scaled / pre-cast streams (wrapper-side)
        q_s = _pad2d(qn * inv_t, n_pad, dp).astype(self.matmul_dtype)     # (Np, Dp)
        k_s = _pad2d(keys, m_pad, dp).astype(self.matmul_dtype)           # (Mp, Dp)
        bias = jnp.where(jnp.arange(m_pad) < m, bias_valid, _NEG_INF)
        bias = bias.astype(jnp.float32).reshape(m_pad, 1)                 # (Mp, 1)
        seed_p = jnp.pad(seed.astype(jnp.float32), (0, n_pad - n)).reshape(1, n_pad)

        kernel = functools.partial(_lse_stream_kernel, shift=shift,
                                   use_fixed_shift=use_fixed_shift)
        cost = pl.CostEstimate(
            flops=int(2 * n_pad * m_pad * dp),
            transcendentals=int(n_pad * m_pad + 2 * n_pad),
            bytes_accessed=int(esize * (n_pad * dp + num_i * m_pad * dp)
                               + 4 * (num_i * m_pad + 3 * n_pad)))
        vmem_limit = int(min(max(int(stream_bytes(tq, tk) * 1.25) + (4 << 20),
                                 32 << 20), 64 << 20))

        out = pl.pallas_call(
            kernel,
            out_shape=jax.ShapeDtypeStruct((1, n_pad), jnp.float32),
            grid_spec=pltpu.PrefetchScalarGridSpec(
                num_scalar_prefetch=0,
                grid=(num_i, num_k),
                in_specs=[
                    pl.BlockSpec((tq, dp), lambda i, k: (i, 0)),   # q tile (resident over k)
                    pl.BlockSpec((1, tq), lambda i, k: (0, i)),    # seed logit row (resident)
                    pl.BlockSpec((tk, dp), lambda i, k: (k, 0)),   # key tile (pipelined)
                    pl.BlockSpec((tk, 1), lambda i, k: (k, 0)),    # key bias / pad mask
                ],
                out_specs=pl.BlockSpec((1, tq), lambda i, k: (0, i)),   # lane-dense loss row
                scratch_shapes=[
                    pltpu.VMEM((1, tq), jnp.float32),   # running sum  l
                    pltpu.VMEM((1, tq), jnp.float32),   # running max  m (fallback path)
                ],
            ),
            compiler_params=pltpu.CompilerParams(
                dimension_semantics=("parallel", "arbitrary"),
                vmem_limit_bytes=vmem_limit),
            cost_estimate=cost,
        )(q_s, seed_p, k_s, bias)
        return out.reshape(n_pad)[:n]


# ----------------------------- pure-JAX reference -----------------------------
def _ref_info_nce(query, positive_key, negative_keys=None, temperature=0.1, reduction='mean'):
    hi = jax.lax.Precision.HIGHEST

    def norm(x):
        nrm = jnp.sqrt(jnp.sum(x * x, axis=-1, keepdims=True))
        return x / jnp.maximum(nrm, 1e-12)

    q = norm(query.astype(jnp.float32))
    p = norm(positive_key.astype(jnp.float32))
    if negative_keys is not None:
        nk = norm(negative_keys.astype(jnp.float32))
        n = q.shape[0]
        sim = jnp.matmul(q, q.T, precision=hi)
        mask = ~jnp.eye(n, dtype=bool)
        pos = jnp.sum(jnp.where(mask, sim, 0.0), axis=1, keepdims=True) / (n - 1)
        neg = jnp.matmul(q, nk.T, precision=hi)
        logits = jnp.concatenate([pos, neg], axis=1) / temperature
        labels = jnp.zeros((n,), dtype=jnp.int32)
    else:
        logits = jnp.matmul(q, p.T, precision=hi) / temperature
        labels = jnp.arange(q.shape[0])
    logp = jax.nn.log_softmax(logits, axis=-1)
    per = -jnp.take_along_axis(logp, labels[:, None], axis=1)[:, 0]
    if reduction == 'mean':
        return jnp.mean(per)
    if reduction == 'sum':
        return jnp.sum(per)
    return per


if __name__ == "__main__":
    key = jax.random.PRNGKey(0)
    ks = jax.random.split(key, 9)

    # --- case 1/2: single-tile shapes ----------------------------------------
    N, D, M = 8, 32, 16
    q = jax.random.normal(ks[0], (N, D), jnp.float32)
    p = jax.random.normal(ks[1], (N, D), jnp.float32)
    nk = jax.random.normal(ks[2], (M, D), jnp.float32)

    loss_fn = MyInfoNCE(temperature=0.1)

    out1 = loss_fn(q, p, nk)                    # unpaired negatives (default mode)
    jax.block_until_ready(out1)
    ref1 = _ref_info_nce(q, p, nk, 0.1)
    assert jnp.allclose(out1, ref1, atol=5e-4, rtol=5e-4), (out1, ref1)

    out2 = loss_fn(q, p, None)                  # in-batch negatives
    jax.block_until_ready(out2)
    ref2 = _ref_info_nce(q, p, None, 0.1)
    assert jnp.allclose(out2, ref2, atol=5e-4, rtol=5e-4), (out2, ref2)

    # --- case 3/4: multiple key tiles + padded/masked key columns ------------
    N2, D2, M2 = 24, 48, 40
    q2 = jax.random.normal(ks[3], (N2, D2), jnp.float32)
    p2 = jax.random.normal(ks[4], (N2, D2), jnp.float32)
    nk2 = jax.random.normal(ks[5], (M2, D2), jnp.float32)

    loss_tiled = MyInfoNCE(temperature=0.07, block_q=8, block_k=16)

    out3 = loss_tiled(q2, p2, nk2)
    jax.block_until_ready(out3)
    ref3 = _ref_info_nce(q2, p2, nk2, 0.07)
    assert jnp.allclose(out3, ref3, atol=5e-4, rtol=5e-4), (out3, ref3)

    out4 = loss_tiled(q2, p2, None)
    jax.block_until_ready(out4)
    ref4 = _ref_info_nce(q2, p2, None, 0.07)
    assert jnp.allclose(out4, ref4, atol=5e-4, rtol=5e-4), (out4, ref4)

    # --- case 5/6: multiple q tiles (parallel axis) + padded q rows ----------
    N3, D3, M3 = 160, 96, 272
    q3 = jax.random.normal(ks[6], (N3, D3), jnp.float32)
    p3 = jax.random.normal(ks[7], (N3, D3), jnp.float32)
    nk3 = jax.random.normal(ks[8], (M3, D3), jnp.float32)

    loss_big = MyInfoNCE(temperature=0.1, block_q=128, block_k=64)

    out5 = loss_big(q3, p3, nk3)
    jax.block_until_ready(out5)
    ref5 = _ref_info_nce(q3, p3, nk3, 0.1)
    assert jnp.allclose(out5, ref5, atol=2e-3, rtol=2e-3), (out5, ref5)

    out6 = loss_big(q3, p3, None)
    jax.block_until_ready(out6)
    ref6 = _ref_info_nce(q3, p3, None, 0.1)
    assert jnp.allclose(out6, ref6, atol=2e-3, rtol=2e-3), (out6, ref6)

    # --- case 7: reduction='none' (per-sample losses) ------------------------
    per = MyInfoNCE(temperature=0.1, reduction='none')(q, p, nk)
    jax.block_until_ready(per)
    per_ref = _ref_info_nce(q, p, nk, 0.1, reduction='none')
    assert jnp.allclose(per, per_ref, atol=5e-4, rtol=5e-4), (per, per_ref)

    # --- case 8: bf16 streams (f32 accumulation / softmax) -------------------
    out8 = MyInfoNCE(temperature=0.1, matmul_dtype=jnp.bfloat16)(q, p, nk)
    jax.block_until_ready(out8)
    assert jnp.allclose(out8, ref1, atol=5e-2, rtol=5e-2), (out8, ref1)

    # --- case 9: tiny temperature -> running-max logsumexp fallback ----------
    out9 = MyInfoNCE(temperature=0.01)(q, p, nk)
    jax.block_until_ready(out9)
    ref9 = _ref_info_nce(q, p, nk, 0.01)
    assert jnp.allclose(out9, ref9, atol=5e-3, rtol=5e-3), (out9, ref9)

    print("KERNEL_OK")
</pallas_src>

<mosaic_0001>
module attributes {stable_mosaic.version = 11 : i64} {
  func.func @_lse_stream_kernel(%arg0: i32, %arg1: i32, %arg2: memref<8x128xf32, #tpu.memory_space<vmem>>, %arg3: memref<1x8xf32, #tpu.memory_space<vmem>>, %arg4: memref<16x128xf32, #tpu.memory_space<vmem>>, %arg5: memref<16x1xf32, #tpu.memory_space<vmem>>, %arg6: memref<1x8xf32, #tpu.memory_space<vmem>>, %arg7: memref<1x8xf32, #tpu.memory_space<vmem>>, %arg8: memref<1x8xf32, #tpu.memory_space<vmem>>) attributes {dimension_semantics = [#tpu.dimension_semantics<parallel>, #tpu.dimension_semantics<arbitrary>], iteration_bounds = array<i64: 1, 1>, scalar_prefetch = 0 : i64, scratch_operands = 2 : i64, tpu.core_type = #tpu.core_type<tc>, window_params = [{transform_indices = @transform_0, window_bounds = array<i64: 8, 128>}, {transform_indices = @transform_1, window_bounds = array<i64: 1, 8>}, {transform_indices = @transform_2, window_bounds = array<i64: 16, 128>}, {transform_indices = @transform_3, window_bounds = array<i64: 16, 1>}, {transform_indices = @transform_4, window_bounds = array<i64: 1, 8>}]} {
    %c0 = arith.constant 0 : index
    %c0_0 = arith.constant 0 : index
    %0 = vector.load %arg4[%c0, %c0_0] : memref<16x128xf32, #tpu.memory_space<vmem>>, vector<16x128xf32>
    %c0_1 = arith.constant 0 : index
    %c0_2 = arith.constant 0 : index
    %1 = vector.load %arg2[%c0_1, %c0_2] : memref<8x128xf32, #tpu.memory_space<vmem>>, vector<8x128xf32>
    %cst = arith.constant dense<0.000000e+00> : vector<16x8xf32>
    %2 = tpu.matmul %0, %1, %cst {dimension_numbers = #tpu.dot_dimension_numbers<[1], [1], [0], [0], [0, 0, 1, 0], [], []>} : vector<16x128xf32>, vector<8x128xf32>, vector<16x8xf32> -> vector<16x8xf32>
    %c0_3 = arith.constant 0 : index
    %c0_4 = arith.constant 0 : index
    %3 = vector.load %arg5[%c0_3, %c0_4] : memref<16x1xf32, #tpu.memory_space<vmem>>, vector<16x1xf32>
    %4 = vector.broadcast %3 : vector<16x1xf32> to vector<16x8xf32>
    %5 = arith.addf %2, %4 : vector<16x8xf32>
    %c0_i32 = arith.constant 0 : i32
    %6 = arith.cmpi eq, %arg1, %c0_i32 : i32
    %7 = arith.extui %6 : i1 to i32
    %c0_i32_5 = arith.constant 0 : i32
    %8 = arith.cmpi ne, %7, %c0_i32_5 : i32
    scf.if %8 {
      %c0_13 = arith.constant 0 : index
      %c0_14 = arith.constant 0 : index
      %18 = vector.load %arg3[%c0_13, %c0_14] : memref<1x8xf32, #tpu.memory_space<vmem>>, vector<1x8xf32>
      %cst_15 = arith.constant 1.000000e+01 : f32
      %19 = vector.broadcast %cst_15 : f32 to vector<1x8xf32>
      %20 = arith.subf %18, %19 : vector<1x8xf32>
      %21 = math.exp %20 : vector<1x8xf32>
      %c0_16 = arith.constant 0 : index
      %c0_17 = arith.constant 0 : index
      %22 = vector.load %arg7[%c0_16, %c0_17] : memref<1x8xf32, #tpu.memory_space<vmem>>, vector<1x8xf32>
      tpu.vector_store %arg7[%c0_16, %c0_17], %21 {strides = array<i32>} : memref<1x8xf32, #tpu.memory_space<vmem>>, vector<1x8xf32>,
    } else {
    }
    %c0_6 = arith.constant 0 : index
    %c0_7 = arith.constant 0 : index
    %9 = vector.load %arg7[%c0_6, %c0_7] : memref<1x8xf32, #tpu.memory_space<vmem>>, vector<1x8xf32>
    %10 = math.exp %5 : vector<16x8xf32>
    %cst_8 = arith.constant dense<0.000000e+00> : vector<8xf32>
    %11 = vector.multi_reduction <add>, %10, %cst_8 [0] : vector<16x8xf32> to vector<8xf32>
    %12 = vector.shape_cast %11 : vector<8xf32> to vector<1x8xf32>
    %13 = arith.addf %9, %12 : vector<1x8xf32>
    %c0_9 = arith.constant 0 : index
    %c0_10 = arith.constant 0 : index
    %14 = vector.load %arg7[%c0_9, %c0_10] : memref<1x8xf32, #tpu.memory_space<vmem>>, vector<1x8xf32>
    tpu.vector_store %arg7[%c0_9, %c0_10], %13 {strides = array<i32>} : memref<1x8xf32, #tpu.memory_space<vmem>>, vector<1x8xf32>,
    %c0_i32_11 = arith.constant 0 : i32
    %15 = arith.cmpi eq, %arg1, %c0_i32_11 : i32
    %16 = arith.extui %15 : i1 to i32
    %c0_i32_12 = arith.constant 0 : i32
    %17 = arith.cmpi ne, %16, %c0_i32_12 : i32
    scf.if %17 {
      %c0_13 = arith.constant 0 : index
      %c0_14 = arith.constant 0 : index
      %18 = vector.load %arg7[%c0_13, %c0_14] : memref<1x8xf32, #tpu.memory_space<vmem>>, vector<1x8xf32>
      %19 = math.log %18 : vector<1x8xf32>
      %cst_15 = arith.constant 1.000000e+01 : f32
      %20 = vector.broadcast %cst_15 : f32 to vector<1x8xf32>
      %21 = arith.addf %20, %19 : vector<1x8xf32>
      %c0_16 = arith.constant 0 : index
      %c0_17 = arith.constant 0 : index
      %22 = vector.load %arg6[%c0_16, %c0_17] : memref<1x8xf32, #tpu.memory_space<vmem>>, vector<1x8xf32>
      tpu.vector_store %arg6[%c0_16, %c0_17], %21 {strides = array<i32>} : memref<1x8xf32, #tpu.memory_space<vmem>>, vector<1x8xf32>,
    } else {
    }
    return
  }
  func.func @transform_0(%arg0: i32, %arg1: i32) -> (i32, i32) {
    %c0_i32 = arith.constant 0 : i32
    %c0_i32_0 = arith.constant 0 : i32
    return %arg0, %c0_i32 : i32, i32
  }
  func.func @transform_1(%arg0: i32, %arg1: i32) -> (i32, i32) {
    %c0_i32 = arith.constant 0 : i32
    %c0_i32_0 = arith.constant 0 : i32
    return %c0_i32, %arg0 : i32, i32
  }
  func.func @transform_2(%arg0: i32, %arg1: i32) -> (i32, i32) {
    %c0_i32 = arith.constant 0 : i32
    %c0_i32_0 = arith.constant 0 : i32
    return %arg1, %c0_i32 : i32, i32
  }
  func.func @transform_3(%arg0: i32, %arg1: i32) -> (i32, i32) {
    %c0_i32 = arith.constant 0 : i32
    %c0_i32_0 = arith.constant 0 : i32
    return %arg1, %c0_i32 : i32, i32
  }
  func.func @transform_4(%arg0: i32, %arg1: i32) -> (i32, i32) {
    %c0_i32 = arith.constant 0 : i32
    %c0_i32_0 = arith.constant 0 : i32
    return %c0_i32, %arg0 : i32, i32
  }
}

</mosaic_0001>

<bundles_post_ra>
// kernel: tpu_custom_call.1
= control target key start
LH: loop header
LB: loop body
LE: loop exit
PB: predicated region body
PF: predicated region fallthrough
CT: control target
= control target key end

     0   :  { %9 = vsyncpa [#allocation5], 0  ;;  %s288_s0 = inlined_call_operand.hbm [shape: f32[8,128], index: 0, kind: input, shape index: {}]   ;;  %s289_s1 = inlined_call_operand.vmem [shape: f32[1,8], index: 1, kind: input, shape index: {}]   ;;  %s290_s2 = inlined_call_operand.vmem [shape: f32[16,128], index: 2, kind: input, shape index: {}]   ;;  %s291_s3 = inlined_call_operand.vmem [shape: f32[16,1], index: 3, kind: input, shape index: {}]   ;;  %s292_s4 = inlined_call_operand.hbm [shape: f32[1,8], index: 4, kind: output, shape index: {}]  }
   0x1   :  { %10 = vsyncpa [#allocation6], 0  ;;  %s236_s15 = smov [#allocation4]  }
   0x2   :  { %s17_s16 = sshll.u32 %s236_s15, 4  ;;  %s18_s16 = int_to_ptr.vmem [resolvable:$true] %s17_s16 }
   0x3   :  { %s200_s17 = scalar_lea.vmem %s18_s16, 128  ;;  %p205_p1 = scmp.lt.s32.totalorder %s18_s16, %s18_s16 }
   0x4   :  { %p201_p0 = scmp.ne.s32.totalorder %s18_s16, %s200_s17  ;;  %p206_p2 = scmp.lt.s32.totalorder %s200_s17, %s200_s17 }
   0x6   :  { %p207_p3 = por %p206_p2, %p205_p1 }
   0x8   :  { %p208_p4 = pnand %p207_p3, %p201_p0 }
   0xa   :  { %211 = shalt.err (!%p208_p4)
}
   0xb   :  { %20 = dma.hbm_to_vmem [thread:$0]  %s288_s0, 128, %s18_s16, [#allocation5]  }
   0xc   :  { %232 = dma.done.wait [#allocation5], 128  }
   0xd   :  { %233 = vsyncadd [#allocation5], 4294967168  ;;  %v237_v0 = vmov 0   ;;  %v32_v1 = vld [vmem:[#allocation4] sm:$0xff]  ;;  %v124_v6 = vld [vmem:[%s289_s1] sm:$0x1] }
   0xe   :  { %183 = vset.pattern.permute.xlu0 %v237_v0  ;;  %v30_v2 = vld [vmem:[%s290_s2] sm:$0xff]  ;;  %175 = vmatprep.subr.mxu0 %v32_v1  ;;  %v31_v4 = vld [vmem:[%s290_s2 + $0x8] sm:$0xff]  ;;  %v171_v7 = vadd.f32 -10.0, %v124_v6  ;;  %vm128_vm0 = vcmask 57344   ;;  %vm135_vm1 = vcmask 64512   ;;  %s238_s1 = smov [#allocation7]  }
   0xf   :  { %177 = vmatprep.mubr.f32.mxu0 %v30_v2  ;;  %v33_v3 = vld [vmem:[%s291_s3] sm:$0xff]  ;;  %176 = vmatpush3.xpose.msra.mxu0 %v32_v1  ;;  %v34_v5 = vld [vmem:[%s291_s3 + $0x8] sm:$0xff]  ;;  %s162_s2 = sshll.u32 %s238_s1, 4  ;;  %s163_s2 = int_to_ptr.vmem [resolvable:$true] %s162_s2 }
  0x10   :  { %37 = vperm.xlu0 %183, %v33_v3   ;;  %v126_v8 = vmul.f32 1.442695, %v171_v7  ;;  %s212_s3 = scalar_lea.vmem %s163_s2, 16  ;;  %s216_s29 = scalar_lea.vmem %s163_s2, 32 }
  0x11   :  { %p213_p5 = scmp.ne.s32.totalorder %s163_s2, %s212_s3  ;;  %p217_p6 = scmp.lt.s32.totalorder %s163_s2, %s163_s2 }
  0x12   :  { %178 = vmatmul.mubr.f32.vlgmr.msra.gmra.mxu0 %v31_v4  ;;  %184 = vpow2.f32 %v126_v8  ;;  %p218_p7 = scmp.lt.s32.totalorder %s216_s29, %s212_s3 }
  0x14   :  { %42 = vperm.xlu0 %183, %v34_v5   ;;  %p219_p8 = por %p218_p7, %p217_p6 }
  0x16   :  { %p220_p9 = pnand %p219_p8, %p213_p5 }
  0x1f   :  { %v185_v9 = vpop.eup %184 }
  0x20   :  { %129 = vst.msk [vmem:[#allocation2] sm:$0x1] %vm128_vm0, %v185_v9 }
  0x27   :  { %v130_v28 = vld [vmem:[#allocation2] sm:$0x1] }
  0x8b   :  { %v38_v10 = vpop.permute.xlu0 %37 }
  0x8f   :  { %v43_v11 = vpop.permute.xlu0 %42 }
  0xd2   :  { %v179_v12 = vpop.f32.mrf.mxu0 }
  0xd3   :  { %v117_v13 = vadd.f32 %v179_v12, %v43_v11 }
  0xd4   :  { %v111_v14 = vpop.f32.mrf.mxu0 }
  0xd5   :  { %v133_v15 = vmul.f32 1.442695, %v117_v13  ;;  %v112_v16 = vadd.f32 %v111_v14, %v38_v10 }
  0xd7   :  { %186 = vpow2.f32 %v133_v15  ;;  %v131_v17 = vmul.f32 1.442695, %v112_v16 }
  0xd9   :  { %188 = vpow2.f32 %v131_v17 }
  0xe4   :  { %v187_v18 = vpop.eup %186 }
  0xe5   :  { %v137_v20 = vsel %vm135_vm1, %v187_v18, 0.0 }
  0xe6   :  { %v189_v19 = vpop.eup %188 }
  0xe7   :  { %v136_v21 = vsel %vm135_vm1, %v189_v19, 0.0 }
  0xe8   :  { %v138_v22 = vadd.f32 %v137_v20, %v136_v21 }
  0xea   :  { %v139_v23 = vrot.slane %v138_v22, 4 }
  0xec   :  { %v140_v24 = vadd.f32 %v139_v23, %v138_v22 }
  0xee   :  { %v141_v25 = vrot.slane %v140_v24, 2 }
  0xf0   :  { %v142_v26 = vadd.f32 %v141_v25, %v140_v24 }
  0xf2   :  { %v143_v27 = vrot.slane %v142_v26, 1 }
  0xf4   :  { %v144_v29 = vadd.f32 %v143_v27, %v142_v26 }
  0xf6   :  { %v145_v30 = vadd.f32 %v144_v29, %v130_v28 }
  0xf8   :  { %147 = vst.msk [vmem:[#allocation2] sm:$0x1] %vm128_vm0, %v145_v30 }
  0xff   :  { %v151_v31 = vld [vmem:[#allocation2] sm:$0x1] }
 0x100   :  { %190 = vlog2.f32 %v151_v31 }
 0x10d   :  { %v191_v32 = vpop.eup %190 }
 0x10e   :  { %v153_v33 = vmul.f32 0.6931472, %v191_v32 }
 0x110   :  { %v154_v34 = vadd.f32 10.0, %v153_v33 }
 0x112   :  { %155 = vst.msk [vmem:[#allocation7] sm:$0x1] %vm128_vm0, %v154_v34 }
 0x113   :  { %223 = shalt.err (!%p220_p9)
}
 0x114   :  { %165 = dma.vmem_to_hbm [thread:$0]  %s163_s2, 16, %s292_s4, [#allocation6]  }
 0x115   :  { %234 = dma.done.wait [#allocation6], 16  }
 0x116   :  { %235 = vsyncadd [#allocation6], 4294967280 }
 0x117   :  { %169 = vsyncpa [#allocation5], 1 }
 0x118   :  { %170 = vsyncpa [#allocation6], 1 }

</bundles_post_ra>
